<compile_context>
chip_gen: v6e
topology: v6e:2x2x1
jax: 0.10.0
libtpu: 0.0.40
codegen_flags: <defaults>
</compile_context>

<pallas_src>
import functools
import math

import jax
import jax.numpy as jnp
from jax import lax
from jax.experimental import pallas as pl
from jax.experimental.pallas import tpu as pltpu

LN_EPS = 1e-5     # torch.nn.LayerNorm default
NEG_INF = -1e9    # additive mask value


def _round_up(n, m):
    return (n + m - 1) // m * m


def _layernorm_f32(t, g, b):
    t = t.astype(jnp.float32)
    mu = jnp.mean(t, axis=-1, keepdims=True)
    tc = t - mu
    var = jnp.mean(tc * tc, axis=-1, keepdims=True)
    return tc * lax.rsqrt(var + LN_EPS) * g + b


# ------------------------ K1: fused LN1 + QKV projection ------------------------
def _ln_qkv_kernel(x_ref, kv_ref, g_ref, b_ref,
                   wq_ref, wk_ref, wv_ref,
                   bq_ref, bk_ref, bv_ref,
                   q_ref, k_ref, v_ref):
    g = g_ref[...].astype(jnp.float32)
    b = b_ref[...].astype(jnp.float32)
    ln_x = _layernorm_f32(x_ref[...], g, b)          # (tile, D)
    ln_kv = _layernorm_f32(kv_ref[...], g, b)        # (tile, D)
    q = jnp.dot(ln_x, wq_ref[...].astype(jnp.float32), preferred_element_type=jnp.float32)
    k = jnp.dot(ln_kv, wk_ref[...].astype(jnp.float32), preferred_element_type=jnp.float32)
    v = jnp.dot(ln_kv, wv_ref[...].astype(jnp.float32), preferred_element_type=jnp.float32)
    q_ref[...] = (q + bq_ref[...].astype(jnp.float32)).astype(q_ref.dtype)
    k_ref[...] = (k + bk_ref[...].astype(jnp.float32)).astype(k_ref.dtype)
    v_ref[...] = (v + bv_ref[...].astype(jnp.float32)).astype(v_ref.dtype)


def ln_qkv(x, kv, g, b, wq, wk, wv, bq, bk, bv, *, row_tile=256):
    B, T, D = x.shape
    x2 = x.reshape(-1, D)
    kv2 = kv.reshape(-1, D)
    N = x2.shape[0]
    tile = min(row_tile, _round_up(N, 8))
    Np = _round_up(N, tile)
    if Np != N:
        pad = ((0, Np - N), (0, 0))
        x2 = jnp.pad(x2, pad)
        kv2 = jnp.pad(kv2, pad)

    row = pl.BlockSpec((tile, D), lambda i: (i, 0))
    wmat = pl.BlockSpec((D, D), lambda i: (0, 0))
    vec = pl.BlockSpec((1, D), lambda i: (0, 0))

    flops = 6 * Np * D * D + 16 * Np * D
    bytes_acc = 4 * (5 * Np * D + 3 * D * D + 8 * D)

    q2, k2, v2 = pl.pallas_call(
        _ln_qkv_kernel,
        out_shape=tuple(jax.ShapeDtypeStruct((Np, D), x.dtype) for _ in range(3)),
        grid_spec=pltpu.PrefetchScalarGridSpec(
            num_scalar_prefetch=0,
            grid=(Np // tile,),
            in_specs=[row, row, vec, vec, wmat, wmat, wmat, vec, vec, vec],
            out_specs=(row, row, row)),
        compiler_params=pltpu.CompilerParams(dimension_semantics=("parallel",)),
        cost_estimate=pl.CostEstimate(flops=flops, transcendentals=2 * Np,
                                      bytes_accessed=bytes_acc),
    )(x2, kv2, g.reshape(1, D), b.reshape(1, D), wq, wk, wv,
      bq.reshape(1, D), bk.reshape(1, D), bv.reshape(1, D))

    return (q2[:N].reshape(B, T, D),
            k2[:N].reshape(B, T, D),
            v2[:N].reshape(B, T, D))


# ---------------------- K2: per-(batch, head) attention --------------------------
def _attn_kernel(q_ref, k_ref, v_ref, bias_ref, o_ref, *, scale):
    q = q_ref[...].astype(jnp.float32)               # (T, dh)
    k = k_ref[...].astype(jnp.float32)               # (T, dh)
    v = v_ref[...].astype(jnp.float32)               # (T, dh)
    s = lax.dot_general(q, k, (((1,), (1,)), ((), ())),
                        preferred_element_type=jnp.float32) * scale   # (Tq, Tk)
    s = s + bias_ref[...].astype(jnp.float32)        # (1, Tk) broadcast over queries
    s = s - jnp.max(s, axis=-1, keepdims=True)
    p = jnp.exp(s)
    p = p / jnp.sum(p, axis=-1, keepdims=True)
    o_ref[...] = jnp.dot(p, v, preferred_element_type=jnp.float32).astype(o_ref.dtype)


def attention(q, k, v, xm, heads):
    B, T, D = q.shape
    H = heads
    dh = D // H

    def split(t):
        return t.reshape(B, T, H, dh).transpose(0, 2, 1, 3)   # (B, H, T, dh)

    qh, kh, vh = split(q), split(k), split(v)
    if xm is None:
        bias = jnp.zeros((B, 1, T), jnp.float32)
    else:
        bias = jnp.where(xm, 0.0, NEG_INF).astype(jnp.float32).reshape(B, 1, T)

    head_spec = pl.BlockSpec((None, None, T, dh), lambda bi, hi: (bi, hi, 0, 0))
    bias_spec = pl.BlockSpec((None, 1, T), lambda bi, hi: (bi, 0, 0))

    ctx = pl.pallas_call(
        functools.partial(_attn_kernel, scale=1.0 / math.sqrt(dh)),
        out_shape=jax.ShapeDtypeStruct((B, H, T, dh), q.dtype),
        grid_spec=pltpu.PrefetchScalarGridSpec(
            num_scalar_prefetch=0,
            grid=(B, H),
            in_specs=[head_spec, head_spec, head_spec, bias_spec],
            out_specs=head_spec),
        compiler_params=pltpu.CompilerParams(
            dimension_semantics=("parallel", "parallel")),
    )(qh, kh, vh, bias)

    return ctx.transpose(0, 2, 1, 3).reshape(B, T, D)


# ---------------- K3: output projection + residual add (attn branch) ------------
def _proj_res_kernel(ctx_ref, res_ref, wo_ref, bo_ref, o_ref):
    acc = jnp.dot(ctx_ref[...].astype(jnp.float32), wo_ref[...].astype(jnp.float32),
                  preferred_element_type=jnp.float32)
    o_ref[...] = (acc + bo_ref[...].astype(jnp.float32)
                  + res_ref[...].astype(jnp.float32)).astype(o_ref.dtype)


def out_proj_residual(ctx, residual, wo, bo, *, row_tile=256):
    B, T, D = ctx.shape
    c2 = ctx.reshape(-1, D)
    r2 = residual.reshape(-1, D)
    N = c2.shape[0]
    tile = min(row_tile, _round_up(N, 8))
    Np = _round_up(N, tile)
    if Np != N:
        pad = ((0, Np - N), (0, 0))
        c2 = jnp.pad(c2, pad)
        r2 = jnp.pad(r2, pad)

    row = pl.BlockSpec((tile, D), lambda i: (i, 0))
    out = pl.pallas_call(
        _proj_res_kernel,
        out_shape=jax.ShapeDtypeStruct((Np, D), ctx.dtype),
        grid_spec=pltpu.PrefetchScalarGridSpec(
            num_scalar_prefetch=0,
            grid=(Np // tile,),
            in_specs=[row, row,
                      pl.BlockSpec((D, D), lambda i: (0, 0)),
                      pl.BlockSpec((1, D), lambda i: (0, 0))],
            out_specs=row),
        compiler_params=pltpu.CompilerParams(dimension_semantics=("parallel",)),
    )(c2, r2, wo, bo.reshape(1, D))
    return out[:N].reshape(B, T, D)


# ------------- K4: fused LN2 + FFN (W1, relu, W2) + residual add -----------------
def _ln_ffn_res_kernel(h_ref, g_ref, b_ref, w1_ref, b1_ref, w2_ref, b2_ref, o_ref):
    h = h_ref[...].astype(jnp.float32)
    ln = _layernorm_f32(h, g_ref[...].astype(jnp.float32), b_ref[...].astype(jnp.float32))
    a = jnp.dot(ln, w1_ref[...].astype(jnp.float32), preferred_element_type=jnp.float32)
    a = jnp.maximum(a + b1_ref[...].astype(jnp.float32), 0.0)
    out = jnp.dot(a, w2_ref[...].astype(jnp.float32), preferred_element_type=jnp.float32)
    o_ref[...] = (out + b2_ref[...].astype(jnp.float32) + h).astype(o_ref.dtype)


def ln_ffn_residual(h, g, b, w1, b1, w2, b2, *, row_tile=256):
    B, T, D = h.shape
    F = w1.shape[1]
    h2 = h.reshape(-1, D)
    N = h2.shape[0]
    tile = min(row_tile, _round_up(N, 8))
    Np = _round_up(N, tile)
    if Np != N:
        h2 = jnp.pad(h2, ((0, Np - N), (0, 0)))

    row = pl.BlockSpec((tile, D), lambda i: (i, 0))
    flops = 4 * Np * D * F + 16 * Np * D
    bytes_acc = 4 * (2 * Np * D + 2 * D * F + F + 3 * D)

    out = pl.pallas_call(
        _ln_ffn_res_kernel,
        out_shape=jax.ShapeDtypeStruct((Np, D), h.dtype),
        grid_spec=pltpu.PrefetchScalarGridSpec(
            num_scalar_prefetch=0,
            grid=(Np // tile,),
            in_specs=[row,
                      pl.BlockSpec((1, D), lambda i: (0, 0)),
                      pl.BlockSpec((1, D), lambda i: (0, 0)),
                      pl.BlockSpec((D, F), lambda i: (0, 0)),
                      pl.BlockSpec((1, F), lambda i: (0, 0)),
                      pl.BlockSpec((F, D), lambda i: (0, 0)),
                      pl.BlockSpec((1, D), lambda i: (0, 0))],
            out_specs=row),
        compiler_params=pltpu.CompilerParams(dimension_semantics=("parallel",)),
        cost_estimate=pl.CostEstimate(flops=flops, transcendentals=Np,
                                      bytes_accessed=bytes_acc),
    )(h2, g.reshape(1, D), b.reshape(1, D), w1, b1.reshape(1, F), w2, b2.reshape(1, D))
    return out[:N].reshape(B, T, D)


# --------------------------------- module -----------------------------------------
class TransformerEncoderLayerPallas:
    """Inference-mode forward of the PyTorch TransformerEncoderLayer."""

    def __init__(self, dim, heads, params, *, row_tile=256):
        assert dim % heads == 0
        self.dim = dim
        self.heads = heads
        self.p = params
        self.row_tile = row_tile

    def __call__(self, x, add, xm):
        p = self.p
        # PreNorm(attn): LN1 on x, and on add if given (else on x for K/V); same LN params.
        kv_in = add if add is not None else x
        q, k, v = ln_qkv(x, kv_in, p["ln1_g"], p["ln1_b"],
                         p["wq"], p["wk"], p["wv"], p["bq"], p["bk"], p["bv"],
                         row_tile=self.row_tile)
        ctx = attention(q, k, v, xm, self.heads)
        h = out_proj_residual(ctx, x, p["wo"], p["bo"], row_tile=self.row_tile)   # + residual x
        # PreNorm(ffn) + residual h
        y = ln_ffn_residual(h, p["ln2_g"], p["ln2_b"],
                            p["w1"], p["fb1"], p["w2"], p["fb2"],
                            row_tile=self.row_tile)
        return y


def init_params(key, dim, ffn_dim, dtype=jnp.float32):
    ks = jax.random.split(key, 12)
    s = 0.1

    def nrm(k, shape):
        return (jax.random.normal(k, shape, jnp.float32) * s).astype(dtype)

    return dict(
        ln1_g=jnp.ones((dim,), dtype), ln1_b=jnp.zeros((dim,), dtype),
        wq=nrm(ks[0], (dim, dim)), bq=nrm(ks[1], (dim,)),
        wk=nrm(ks[2], (dim, dim)), bk=nrm(ks[3], (dim,)),
        wv=nrm(ks[4], (dim, dim)), bv=nrm(ks[5], (dim,)),
        wo=nrm(ks[6], (dim, dim)), bo=nrm(ks[7], (dim,)),
        ln2_g=jnp.ones((dim,), dtype), ln2_b=jnp.zeros((dim,), dtype),
        w1=nrm(ks[8], (dim, ffn_dim)), fb1=nrm(ks[9], (ffn_dim,)),
        w2=nrm(ks[10], (ffn_dim, dim)), fb2=nrm(ks[11], (dim,)),
    )


# -------------------------------- pure-JAX reference -------------------------------
def _ln_ref(x, g, b):
    m = jnp.mean(x, -1, keepdims=True)
    v = jnp.mean((x - m) ** 2, -1, keepdims=True)
    return (x - m) * lax.rsqrt(v + LN_EPS) * g + b


def ref_forward(p, x, add, xm, heads):
    B, T, D = x.shape
    dh = D // heads
    ln_x = _ln_ref(x, p["ln1_g"], p["ln1_b"])
    kv = add if add is not None else x
    ln_kv = _ln_ref(kv, p["ln1_g"], p["ln1_b"])
    q = ln_x @ p["wq"] + p["bq"]
    k = ln_kv @ p["wk"] + p["bk"]
    v = ln_kv @ p["wv"] + p["bv"]

    def split(t):
        return t.reshape(B, T, heads, dh).transpose(0, 2, 1, 3)

    qh, kh, vh = split(q), split(k), split(v)
    s = jnp.einsum("bhqd,bhkd->bhqk", qh, kh) / math.sqrt(dh)
    if xm is not None:
        s = s + jnp.where(xm, 0.0, NEG_INF)[:, None, None, :]
    a = jax.nn.softmax(s, axis=-1)
    ctx = jnp.einsum("bhqk,bhkd->bhqd", a, vh).transpose(0, 2, 1, 3).reshape(B, T, D)
    h = ctx @ p["wo"] + p["bo"] + x
    ln_h = _ln_ref(h, p["ln2_g"], p["ln2_b"])
    f = jnp.maximum(ln_h @ p["w1"] + p["fb1"], 0.0) @ p["w2"] + p["fb2"]
    return f + h


if __name__ == "__main__":
    B, T, D, H = 2, 8, 32, 4
    F = 4 * D
    key = jax.random.PRNGKey(0)
    kx, ka, kp = jax.random.split(key, 3)

    x = jax.random.normal(kx, (B, T, D), jnp.float32)
    add = jax.random.normal(ka, (B, T, D), jnp.float32)
    # key-padding mask xm: True = valid; second sequence has 3 trailing pads
    xm = jnp.array([[True] * T, [True] * (T - 3) + [False] * 3])

    params = init_params(kp, D, F)
    layer = TransformerEncoderLayerPallas(D, H, params)

    # path 1: add is not None (cross-stream K/V) + padding mask
    out = jax.block_until_ready(layer(x, add, xm))
    ref = ref_forward(params, x, add, xm, H)
    assert out.shape == (B, T, D)
    assert jnp.allclose(out, ref, atol=1e-3, rtol=1e-3), float(jnp.max(jnp.abs(out - ref)))

    # path 2: add is None (self-attention), no mask
    out2 = jax.block_until_ready(layer(x, None, None))
    ref2 = ref_forward(params, x, None, None, H)
    assert jnp.allclose(out2, ref2, atol=1e-3, rtol=1e-3), float(jnp.max(jnp.abs(out2 - ref2)))

    print("KERNEL_OK")
</pallas_src>

<mosaic_0001>
module attributes {stable_mosaic.version = 11 : i64} {
  func.func @_ln_qkv_kernel(%arg0: i32, %arg1: memref<16x32xf32, #tpu.memory_space<vmem>>, %arg2: memref<16x32xf32, #tpu.memory_space<vmem>>, %arg3: memref<1x32xf32, #tpu.memory_space<vmem>>, %arg4: memref<1x32xf32, #tpu.memory_space<vmem>>, %arg5: memref<32x32xf32, #tpu.memory_space<vmem>>, %arg6: memref<32x32xf32, #tpu.memory_space<vmem>>, %arg7: memref<32x32xf32, #tpu.memory_space<vmem>>, %arg8: memref<1x32xf32, #tpu.memory_space<vmem>>, %arg9: memref<1x32xf32, #tpu.memory_space<vmem>>, %arg10: memref<1x32xf32, #tpu.memory_space<vmem>>, %arg11: memref<16x32xf32, #tpu.memory_space<vmem>>, %arg12: memref<16x32xf32, #tpu.memory_space<vmem>>, %arg13: memref<16x32xf32, #tpu.memory_space<vmem>>) attributes {dimension_semantics = [#tpu.dimension_semantics<parallel>], iteration_bounds = array<i64: 1>, scalar_prefetch = 0 : i64, scratch_operands = 0 : i64, tpu.core_type = #tpu.core_type<tc>, window_params = [{transform_indices = @transform_0, window_bounds = array<i64: 16, 32>}, {transform_indices = @transform_1, window_bounds = array<i64: 16, 32>}, {pipeline_mode = #tpu.pipeline_mode<synchronous>, transform_indices = @transform_2, window_bounds = array<i64: 1, 32>}, {pipeline_mode = #tpu.pipeline_mode<synchronous>, transform_indices = @transform_3, window_bounds = array<i64: 1, 32>}, {pipeline_mode = #tpu.pipeline_mode<synchronous>, transform_indices = @transform_4, window_bounds = array<i64: 32, 32>}, {pipeline_mode = #tpu.pipeline_mode<synchronous>, transform_indices = @transform_5, window_bounds = array<i64: 32, 32>}, {pipeline_mode = #tpu.pipeline_mode<synchronous>, transform_indices = @transform_6, window_bounds = array<i64: 32, 32>}, {pipeline_mode = #tpu.pipeline_mode<synchronous>, transform_indices = @transform_7, window_bounds = array<i64: 1, 32>}, {pipeline_mode = #tpu.pipeline_mode<synchronous>, transform_indices = @transform_8, window_bounds = array<i64: 1, 32>}, {pipeline_mode = #tpu.pipeline_mode<synchronous>, transform_indices = @transform_9, window_bounds = array<i64: 1, 32>}, {transform_indices = @transform_10, window_bounds = array<i64: 16, 32>}, {transform_indices = @transform_11, window_bounds = array<i64: 16, 32>}, {transform_indices = @transform_12, window_bounds = array<i64: 16, 32>}]} {
    %c0 = arith.constant 0 : index
    %c0_0 = arith.constant 0 : index
    %0 = vector.load %arg3[%c0, %c0_0] : memref<1x32xf32, #tpu.memory_space<vmem>>, vector<1x32xf32>
    %c0_1 = arith.constant 0 : index
    %c0_2 = arith.constant 0 : index
    %1 = vector.load %arg4[%c0_1, %c0_2] : memref<1x32xf32, #tpu.memory_space<vmem>>, vector<1x32xf32>
    %c0_3 = arith.constant 0 : index
    %c0_4 = arith.constant 0 : index
    %2 = vector.load %arg1[%c0_3, %c0_4] : memref<16x32xf32, #tpu.memory_space<vmem>>, vector<16x32xf32>
    %cst = arith.constant dense<0.000000e+00> : vector<16xf32>
    %3 = vector.multi_reduction <add>, %2, %cst [1] : vector<16x32xf32> to vector<16xf32>
    %4 = vector.shape_cast %3 : vector<16xf32> to vector<16x1xf32>
    %cst_5 = arith.constant 3.200000e+01 : f32
    %5 = vector.broadcast %cst_5 : f32 to vector<16x1xf32>
    %6 = arith.divf %4, %5 : vector<16x1xf32>
    %7 = vector.broadcast %6 : vector<16x1xf32> to vector<16x32xf32>
    %8 = arith.subf %2, %7 : vector<16x32xf32>
    %9 = arith.mulf %8, %8 : vector<16x32xf32>
    %cst_6 = arith.constant dense<0.000000e+00> : vector<16xf32>
    %10 = vector.multi_reduction <add>, %9, %cst_6 [1] : vector<16x32xf32> to vector<16xf32>
    %11 = vector.shape_cast %10 : vector<16xf32> to vector<16x1xf32>
    %cst_7 = arith.constant 3.200000e+01 : f32
    %12 = vector.broadcast %cst_7 : f32 to vector<16x1xf32>
    %13 = arith.divf %11, %12 : vector<16x1xf32>
    %cst_8 = arith.constant 9.99999974E-6 : f32
    %14 = vector.broadcast %cst_8 : f32 to vector<16x1xf32>
    %15 = arith.addf %13, %14 : vector<16x1xf32>
    %16 = math.rsqrt %15 : vector<16x1xf32>
    %17 = vector.broadcast %16 : vector<16x1xf32> to vector<16x32xf32>
    %18 = arith.mulf %8, %17 : vector<16x32xf32>
    %19 = vector.broadcast %0 : vector<1x32xf32> to vector<16x32xf32>
    %20 = arith.mulf %18, %19 : vector<16x32xf32>
    %21 = vector.broadcast %1 : vector<1x32xf32> to vector<16x32xf32>
    %22 = arith.addf %20, %21 : vector<16x32xf32>
    %c0_9 = arith.constant 0 : index
    %c0_10 = arith.constant 0 : index
    %23 = vector.load %arg2[%c0_9, %c0_10] : memref<16x32xf32, #tpu.memory_space<vmem>>, vector<16x32xf32>
    %cst_11 = arith.constant dense<0.000000e+00> : vector<16xf32>
    %24 = vector.multi_reduction <add>, %23, %cst_11 [1] : vector<16x32xf32> to vector<16xf32>
    %25 = vector.shape_cast %24 : vector<16xf32> to vector<16x1xf32>
    %cst_12 = arith.constant 3.200000e+01 : f32
    %26 = vector.broadcast %cst_12 : f32 to vector<16x1xf32>
    %27 = arith.divf %25, %26 : vector<16x1xf32>
    %28 = vector.broadcast %27 : vector<16x1xf32> to vector<16x32xf32>
    %29 = arith.subf %23, %28 : vector<16x32xf32>
    %30 = arith.mulf %29, %29 : vector<16x32xf32>
    %cst_13 = arith.constant dense<0.000000e+00> : vector<16xf32>
    %31 = vector.multi_reduction <add>, %30, %cst_13 [1] : vector<16x32xf32> to vector<16xf32>
    %32 = vector.shape_cast %31 : vector<16xf32> to vector<16x1xf32>
    %cst_14 = arith.constant 3.200000e+01 : f32
    %33 = vector.broadcast %cst_14 : f32 to vector<16x1xf32>
    %34 = arith.divf %32, %33 : vector<16x1xf32>
    %cst_15 = arith.constant 9.99999974E-6 : f32
    %35 = vector.broadcast %cst_15 : f32 to vector<16x1xf32>
    %36 = arith.addf %34, %35 : vector<16x1xf32>
    %37 = math.rsqrt %36 : vector<16x1xf32>
    %38 = vector.broadcast %37 : vector<16x1xf32> to vector<16x32xf32>
    %39 = arith.mulf %29, %38 : vector<16x32xf32>
    %40 = vector.broadcast %0 : vector<1x32xf32> to vector<16x32xf32>
    %41 = arith.mulf %39, %40 : vector<16x32xf32>
    %42 = vector.broadcast %1 : vector<1x32xf32> to vector<16x32xf32>
    %43 = arith.addf %41, %42 : vector<16x32xf32>
    %c0_16 = arith.constant 0 : index
    %c0_17 = arith.constant 0 : index
    %44 = vector.load %arg5[%c0_16, %c0_17] : memref<32x32xf32, #tpu.memory_space<vmem>>, vector<32x32xf32>
    %cst_18 = arith.constant dense<0.000000e+00> : vector<16x32xf32>
    %45 = tpu.matmul %22, %44, %cst_18 {dimension_numbers = #tpu.dot_dimension_numbers<[1], [0], [0], [1], [0, 0, 1, 1], [], []>} : vector<16x32xf32>, vector<32x32xf32>, vector<16x32xf32> -> vector<16x32xf32>
    %c0_19 = arith.constant 0 : index
    %c0_20 = arith.constant 0 : index
    %46 = vector.load %arg6[%c0_19, %c0_20] : memref<32x32xf32, #tpu.memory_space<vmem>>, vector<32x32xf32>
    %cst_21 = arith.constant dense<0.000000e+00> : vector<16x32xf32>
    %47 = tpu.matmul %43, %46, %cst_21 {dimension_numbers = #tpu.dot_dimension_numbers<[1], [0], [0], [1], [0, 0, 1, 1], [], []>} : vector<16x32xf32>, vector<32x32xf32>, vector<16x32xf32> -> vector<16x32xf32>
    %c0_22 = arith.constant 0 : index
    %c0_23 = arith.constant 0 : index
    %48 = vector.load %arg7[%c0_22, %c0_23] : memref<32x32xf32, #tpu.memory_space<vmem>>, vector<32x32xf32>
    %cst_24 = arith.constant dense<0.000000e+00> : vector<16x32xf32>
    %49 = tpu.matmul %43, %48, %cst_24 {dimension_numbers = #tpu.dot_dimension_numbers<[1], [0], [0], [1], [0, 0, 1, 1], [], []>} : vector<16x32xf32>, vector<32x32xf32>, vector<16x32xf32> -> vector<16x32xf32>
    %c0_25 = arith.constant 0 : index
    %c0_26 = arith.constant 0 : index
    %50 = vector.load %arg8[%c0_25, %c0_26] : memref<1x32xf32, #tpu.memory_space<vmem>>, vector<1x32xf32>
    %51 = vector.broadcast %50 : vector<1x32xf32> to vector<16x32xf32>
    %52 = arith.addf %45, %51 : vector<16x32xf32>
    %c0_27 = arith.constant 0 : index
    %c0_28 = arith.constant 0 : index
    %53 = vector.load %arg11[%c0_27, %c0_28] : memref<16x32xf32, #tpu.memory_space<vmem>>, vector<16x32xf32>
    tpu.vector_store %arg11[%c0_27, %c0_28], %52 {strides = array<i32>} : memref<16x32xf32, #tpu.memory_space<vmem>>, vector<16x32xf32>,
    %c0_29 = arith.constant 0 : index
    %c0_30 = arith.constant 0 : index
    %54 = vector.load %arg9[%c0_29, %c0_30] : memref<1x32xf32, #tpu.memory_space<vmem>>, vector<1x32xf32>
    %55 = vector.broadcast %54 : vector<1x32xf32> to vector<16x32xf32>
    %56 = arith.addf %47, %55 : vector<16x32xf32>
    %c0_31 = arith.constant 0 : index
    %c0_32 = arith.constant 0 : index
    %57 = vector.load %arg12[%c0_31, %c0_32] : memref<16x32xf32, #tpu.memory_space<vmem>>, vector<16x32xf32>
    tpu.vector_store %arg12[%c0_31, %c0_32], %56 {strides = array<i32>} : memref<16x32xf32, #tpu.memory_space<vmem>>, vector<16x32xf32>,
    %c0_33 = arith.constant 0 : index
    %c0_34 = arith.constant 0 : index
    %58 = vector.load %arg10[%c0_33, %c0_34] : memref<1x32xf32, #tpu.memory_space<vmem>>, vector<1x32xf32>
    %59 = vector.broadcast %58 : vector<1x32xf32> to vector<16x32xf32>
    %60 = arith.addf %49, %59 : vector<16x32xf32>
    %c0_35 = arith.constant 0 : index
    %c0_36 = arith.constant 0 : index
    %61 = vector.load %arg13[%c0_35, %c0_36] : memref<16x32xf32, #tpu.memory_space<vmem>>, vector<16x32xf32>
    tpu.vector_store %arg13[%c0_35, %c0_36], %60 {strides = array<i32>} : memref<16x32xf32, #tpu.memory_space<vmem>>, vector<16x32xf32>,
    return
  }
  func.func @transform_0(%arg0: i32) -> (i32, i32) {
    %c0_i32 = arith.constant 0 : i32
    %c0_i32_0 = arith.constant 0 : i32
    return %arg0, %c0_i32 : i32, i32
  }
  func.func @transform_1(%arg0: i32) -> (i32, i32) {
    %c0_i32 = arith.constant 0 : i32
    %c0_i32_0 = arith.constant 0 : i32
    return %arg0, %c0_i32 : i32, i32
  }
  func.func @transform_2(%arg0: i32) -> (i32, i32) {
    %c0_i32 = arith.constant 0 : i32
    %c0_i32_0 = arith.constant 0 : i32
    %c0_i32_1 = arith.constant 0 : i32
    return %c0_i32, %c0_i32_0 : i32, i32
  }
  func.func @transform_3(%arg0: i32) -> (i32, i32) {
    %c0_i32 = arith.constant 0 : i32
    %c0_i32_0 = arith.constant 0 : i32
    %c0_i32_1 = arith.constant 0 : i32
    return %c0_i32, %c0_i32_0 : i32, i32
  }
  func.func @transform_4(%arg0: i32) -> (i32, i32) {
    %c0_i32 = arith.constant 0 : i32
    %c0_i32_0 = arith.constant 0 : i32
    %c0_i32_1 = arith.constant 0 : i32
    return %c0_i32, %c0_i32_0 : i32, i32
  }
  func.func @transform_5(%arg0: i32) -> (i32, i32) {
    %c0_i32 = arith.constant 0 : i32
    %c0_i32_0 = arith.constant 0 : i32
    %c0_i32_1 = arith.constant 0 : i32
    return %c0_i32, %c0_i32_0 : i32, i32
  }
  func.func @transform_6(%arg0: i32) -> (i32, i32) {
    %c0_i32 = arith.constant 0 : i32
    %c0_i32_0 = arith.constant 0 : i32
    %c0_i32_1 = arith.constant 0 : i32
    return %c0_i32, %c0_i32_0 : i32, i32
  }
  func.func @transform_7(%arg0: i32) -> (i32, i32) {
    %c0_i32 = arith.constant 0 : i32
    %c0_i32_0 = arith.constant 0 : i32
    %c0_i32_1 = arith.constant 0 : i32
    return %c0_i32, %c0_i32_0 : i32, i32
  }
  func.func @transform_8(%arg0: i32) -> (i32, i32) {
    %c0_i32 = arith.constant 0 : i32
    %c0_i32_0 = arith.constant 0 : i32
    %c0_i32_1 = arith.constant 0 : i32
    return %c0_i32, %c0_i32_0 : i32, i32
  }
  func.func @transform_9(%arg0: i32) -> (i32, i32) {
    %c0_i32 = arith.constant 0 : i32
    %c0_i32_0 = arith.constant 0 : i32
    %c0_i32_1 = arith.constant 0 : i32
    return %c0_i32, %c0_i32_0 : i32, i32
  }
  func.func @transform_10(%arg0: i32) -> (i32, i32) {
    %c0_i32 = arith.constant 0 : i32
    %c0_i32_0 = arith.constant 0 : i32
    return %arg0, %c0_i32 : i32, i32
  }
  func.func @transform_11(%arg0: i32) -> (i32, i32) {
    %c0_i32 = arith.constant 0 : i32
    %c0_i32_0 = arith.constant 0 : i32
    return %arg0, %c0_i32 : i32, i32
  }
  func.func @transform_12(%arg0: i32) -> (i32, i32) {
    %c0_i32 = arith.constant 0 : i32
    %c0_i32_0 = arith.constant 0 : i32
    return %arg0, %c0_i32 : i32, i32
  }
}

</mosaic_0001>

<bundles_post_ra>
// kernel: tpu_custom_call.1
= control target key start
LH: loop header
LB: loop body
LE: loop exit
PB: predicated region body
PF: predicated region fallthrough
CT: control target
= control target key end

     0   :  { %18 = vsyncpa [#allocation3], 0  ;;  %s937_s0 = inlined_call_operand.hbm [shape: f32[16,32], index: 0, kind: input, shape index: {}]   ;;  %s938_s1 = inlined_call_operand.hbm [shape: f32[16,32], index: 1, kind: input, shape index: {}]   ;;  %s939_s2 = inlined_call_operand.vmem [shape: f32[1,32], index: 2, kind: input, shape index: {}]   ;;  %s940_s3 = inlined_call_operand.vmem [shape: f32[1,32], index: 3, kind: input, shape index: {}]   ;;  %s941_s4 = inlined_call_operand.hbm [shape: f32[32,32], index: 4, kind: input, shape index: {}]   ;;  %s942_s5 = inlined_call_operand.hbm [shape: f32[32,32], index: 5, kind: input, shape index: {}]   ;;  %s943_s6 = inlined_call_operand.hbm [shape: f32[32,32], index: 6, kind: input, shape index: {}]   ;;  %s944_s7 = inlined_call_operand.vmem [shape: f32[1,32], index: 7, kind: input, shape index: {}]   ;;  %s945_s8 = inlined_call_operand.vmem [shape: f32[1,32], index: 8, kind: input, shape index: {}]   ;;  %s946_s9 = inlined_call_operand.vmem [shape: f32[1,32], index: 9, kind: input, shape index: {}]   ;;  %s947_s10 = inlined_call_operand.hbm [shape: f32[16,32], index: 10, kind: output, shape index: {0}]   ;;  %s948_s11 = inlined_call_operand.hbm [shape: f32[16,32], index: 11, kind: output, shape index: {1}]   ;;  %s949_s12 = inlined_call_operand.hbm [shape: f32[16,32], index: 12, kind: output, shape index: {2}]  }
   0x1   :  { %19 = vsyncpa [#allocation6], 0 }
   0x2   :  { %20 = vsyncpa [#allocation9], 0 }
   0x3   :  { %21 = vsyncpa [#allocation4], 0 }
   0x4   :  { %22 = vsyncpa [#allocation13], 0  ;;  %s764_s21 = smov [#allocation5]   ;;  %s765_s23 = smov [#allocation8]  }
   0x5   :  { %s40_s22 = sshll.u32 %s764_s21, 4  ;;  %s68_s24 = sshll.u32 %s765_s23, 4  ;;  %s41_s22 = int_to_ptr.vmem [resolvable:$true] %s40_s22  ;;  %s69_s24 = int_to_ptr.vmem [resolvable:$true] %s68_s24 }
   0x6   :  { %s602_s25 = scalar_lea.vmem %s41_s22, 256  ;;  %p607_p1 = scmp.lt.s32.totalorder %s41_s22, %s41_s22 }
   0x7   :  { %p603_p0 = scmp.ne.s32.totalorder %s41_s22, %s602_s25  ;;  %p608_p2 = scmp.lt.s32.totalorder %s602_s25, %s602_s25 }
   0x9   :  { %p609_p3 = por %p608_p2, %p607_p1 }
   0xb   :  { %p610_p4 = pnand %p609_p3, %p603_p0 }
   0xd   :  { %613 = shalt.err (!%p610_p4)
}
   0xe   :  { %s766_s26 = smov 128   ;;  %s767_s27 = smov 8  }
   0xf   :  { %46 = dma.hbm_to_vmem [thread:$0]  %s938_s1, 256, %s41_s22, [#allocation6], %s766_s26, %s766_s26, %s767_s27  }
  0x10   :  { %s622_s30 = scalar_lea.vmem %s69_s24, 512  ;;  %p627_p6 = scmp.lt.s32.totalorder %s69_s24, %s69_s24 }
  0x11   :  { %p623_p5 = scmp.ne.s32.totalorder %s69_s24, %s622_s30  ;;  %p628_p7 = scmp.lt.s32.totalorder %s622_s30, %s622_s30 }
  0x13   :  { %p629_p8 = por %p628_p7, %p627_p6 }
  0x15   :  { %p630_p9 = pnand %p629_p8, %p623_p5 }
  0x17   :  { %633 = shalt.err (!%p630_p9)
}
  0x18   :  { %74 = dma.hbm_to_vmem [thread:$0]  %s942_s5, 512, %s69_s24, [#allocation9], %s766_s26, %s766_s26, %s767_s27  }
  0x19   :  { %s768_s15 = smov [#allocation2]   ;;  %s769_s17 = smov [#allocation7]  }
  0x1a   :  { %s28_s16 = sshll.u32 %s768_s15, 4  ;;  %s56_s18 = sshll.u32 %s769_s17, 4  ;;  %s29_s16 = int_to_ptr.vmem [resolvable:$true] %s28_s16  ;;  %s57_s18 = int_to_ptr.vmem [resolvable:$true] %s56_s18 }
  0x1b   :  { %s642_s1 = scalar_lea.vmem %s29_s16, 256  ;;  %p647_p11 = scmp.lt.s32.totalorder %s29_s16, %s29_s16 }
  0x1c   :  { %p643_p10 = scmp.ne.s32.totalorder %s29_s16, %s642_s1  ;;  %p648_p12 = scmp.lt.s32.totalorder %s642_s1, %s642_s1 }
  0x1e   :  { %p649_p13 = por %p648_p12, %p647_p11 }
  0x20   :  { %p650_p0 = pnand %p649_p13, %p643_p10 }
  0x22   :  { %653 = shalt.err (!%p650_p0)
}
  0x23   :  { %34 = dma.hbm_to_vmem [thread:$0]  %s937_s0, 256, %s29_s16, [#allocation3], %s766_s26, %s766_s26, %s767_s27  }
  0x24   :  { %s662_s5 = scalar_lea.vmem %s57_s18, 512  ;;  %p667_p2 = scmp.lt.s32.totalorder %s57_s18, %s57_s18 }
  0x25   :  { %p663_p1 = scmp.ne.s32.totalorder %s57_s18, %s662_s5  ;;  %p668_p3 = scmp.lt.s32.totalorder %s662_s5, %s662_s5 }
  0x27   :  { %p669_p4 = por %p668_p3, %p667_p2 }
  0x29   :  { %p670_p5 = pnand %p669_p4, %p663_p1 }
  0x2b   :  { %673 = shalt.err (!%p670_p5)
}
  0x2c   :  { %62 = dma.hbm_to_vmem [thread:$0]  %s941_s4, 512, %s57_s18, [#allocation6], %s766_s26, %s766_s26, %s767_s27  }
  0x2d   :  { %s770_s23 = smov [#allocation10]  }
  0x2e   :  { %s80_s24 = sshll.u32 %s770_s23, 4  ;;  %s81_s24 = int_to_ptr.vmem [resolvable:$true] %s80_s24 }
  0x2f   :  { %s682_s25 = scalar_lea.vmem %s81_s24, 512  ;;  %p687_p7 = scmp.lt.s32.totalorder %s81_s24, %s81_s24 }
  0x30   :  { %p683_p6 = scmp.ne.s32.totalorder %s81_s24, %s682_s25  ;;  %p688_p8 = scmp.lt.s32.totalorder %s682_s25, %s682_s25 }
  0x32   :  { %p689_p9 = por %p688_p8, %p687_p7 }
  0x34   :  { %p690_p10 = pnand %p689_p9, %p683_p6 }
  0x36   :  { %693 = shalt.err (!%p690_p10)
}
  0x37   :  { %86 = dma.hbm_to_vmem [thread:$0]  %s943_s6, 512, %s81_s24, [#allocation9], %s766_s26, %s766_s26, %s767_s27  }
  0x38   :  { %754 = dma.done.wait [#allocation3], 256  }
  0x39   :  { %755 = vsyncadd [#allocation3], 4294967040 }
  0x3a   :  { %756 = dma.done.wait [#allocation6], 768  }
  0x3b   :  { %757 = vsyncadd [#allocation6], 4294966528 }
  0x3c   :  { %758 = dma.done.wait [#allocation9], 1024  }
  0x3d   :  { %759 = vsyncadd [#allocation9], 4294966272  ;;  %vm112_vm0 = vcmask 261120   ;;  %v110_v0 = vld [vmem:[#allocation2] sm:$0xff]  ;;  %v156_v1 = vld [vmem:[#allocation5] sm:$0xff]  ;;  %s771_s13 = smov [#allocation11]  }
  0x3e   :  { %v111_v2 = vld [vmem:[#allocation2 + $0x8] sm:$0xff]  ;;  %v113_v3 = vsel %vm112_vm0, %v110_v0, 0.0  ;;  %v158_v4 = vsel %vm112_vm0, %v156_v1, 0.0  ;;  %v157_v5 = vld [vmem:[#allocation5 + $0x8] sm:$0xff]  ;;  %v190_v29 = vld [vmem:[#allocation7 + $0x10] sm:$0xff]  ;;  %s469_s14 = sshll.u32 %s771_s13, 4  ;;  %s470_s14 = int_to_ptr.vmem [resolvable:$true] %s469_s14 }
  0x3f   :  { %114 = vadd.xlane.f32.xlu0 %v113_v3  ;;  %159 = vadd.xlane.f32.xlu1 %v158_v4  ;;  %v116_v6 = vsel %vm112_vm0, %v111_v2, 0.0  ;;  %v161_v7 = vsel %vm112_vm0, %v157_v5, 0.0  ;;  %v191_v28 = vld [vmem:[#allocation7 + $0x18] sm:$0xff]  ;;  %v189_v30 = vld [vmem:[#allocation7 + $0x8] sm:$0xff]  ;;  %v188_v32 = vld [vmem:[#allocation7] sm:$0xff]  ;;  %s772_s17 = smov [#allocation12]   ;;  %p699_p12 = scmp.lt.s32.totalorder %s470_s14, %s470_s14 }
  0x40   :  { %543 = vmatprep.subr.mxu0 %v191_v28  ;;  %v195_v31 = vld [vmem:[#allocation8 + $0x18] sm:$0xff]  ;;  %v194_v33 = vld [vmem:[#allocation8 + $0x10] sm:$0xff]  ;;  %v193_v35 = vld [vmem:[#allocation8 + $0x8] sm:$0xff]  ;;  %s481_s18 = sshll.u32 %s772_s17, 4  ;;  %s694_s19 = scalar_lea.vmem %s470_s14, 256  ;;  %s482_s18 = int_to_ptr.vmem [resolvable:$true] %s481_s18 }
  0x41   :  { %544 = vmatpush3.msra.mxu0 %v191_v28  ;;  %554 = vmatprep.subr.mxu1 %v195_v31  ;;  %v199_v34 = vld [vmem:[#allocation10 + $0x18] sm:$0xff]  ;;  %v192_v36 = vld [vmem:[#allocation8] sm:$0xff]  ;;  %v197_v3 = vld [vmem:[#allocation10 + $0x8] sm:$0xff]  ;;  %p695_p11 = scmp.ne.s32.totalorder %s470_s14, %s694_s19  ;;  %p700_p13 = scmp.lt.s32.totalorder %s694_s19, %s694_s19 }
  0x42   :  { %545 = vmatprep.subr.mxu0 %v190_v29  ;;  %555 = vmatpush3.msra.mxu1 %v195_v31  ;;  %v514_v50 = vld [vmem:[%s939_s2] ss:$0 sm:$0xff] }
  0x43   :  { %117 = vadd.xlane.f32.xlu0 %v116_v6  ;;  %162 = vadd.xlane.f32.xlu1 %v161_v7  ;;  %v515_v52 = vld [vmem:[%s940_s3] ss:$0 sm:$0xff]  ;;  %p701_p0 = por %p700_p13, %p699_p12 }
  0x44   :  { %546 = vmatpush3.msra.mxu0 %v190_v29  ;;  %556 = vmatprep.subr.mxu1 %v194_v33  ;;  %v516_v6 = vld [vmem:[%s944_s7] ss:$0 sm:$0xff] }
  0x45   :  { %547 = vmatprep.subr.mxu0 %v189_v30  ;;  %557 = vmatpush3.msra.mxu1 %v194_v33  ;;  %p702_p1 = pnand %p701_p0, %p695_p11 }
  0x46   :  { %548 = vmatpush3.msra.mxu0 %v189_v30  ;;  %558 = vmatprep.subr.mxu1 %v193_v35 }
  0x47   :  { %549 = vmatprep.subr.mxu0 %v188_v32  ;;  %559 = vmatpush3.msra.mxu1 %v193_v35 }
  0x48   :  { %550 = vmatpush3.msra.mxu0 %v188_v32  ;;  %560 = vmatprep.subr.mxu1 %v192_v36 }
  0x49   :  { %565 = vmatprep.subr.mxu0 %v199_v34  ;;  %561 = vmatpush3.msra.mxu1 %v192_v36 }
  0xc8   :  { %v115_v8 = vpop.xlane.xlu0 %114  ;;  %v160_v9 = vpop.xlane.xlu1 %159 }
  0xc9   :  { %v120_v10 = vmul.f32 0.03125, %v115_v8  ;;  %v164_v11 = vmul.f32 0.03125, %v160_v9 }
  0xcb   :  { %v873_v12 = vsub.f32 %v110_v0, %v120_v10  ;;  %v875_v13 = vsub.f32 %v156_v1, %v164_v11  ;;  %v198_v1 = vld [vmem:[#allocation10 + $0x10] sm:$0xff]  ;;  %v519_v10 = vld [vmem:[%s945_s8] ss:$0 sm:$0xff] }
  0xcc   :  { %v118_v14 = vpop.xlane.xlu0 %117  ;;  %v163_v15 = vpop.xlane.xlu1 %162 }
  0xcd   :  { %v121_v16 = vmul.f32 0.03125, %v118_v14  ;;  %v165_v17 = vmul.f32 0.03125, %v163_v15  ;;  %v124_v18 = vmul.f32 %v873_v12, %v873_v12  ;;  %v168_v19 = vmul.f32 %v875_v13, %v875_v13  ;;  %v522_v14 = vld [vmem:[%s946_s9] ss:$0 sm:$0xff] }
  0xcf   :  { %v123_v20 = vsub.f32 %v111_v2, %v121_v16  ;;  %v881_v21 = vsub.f32 %v157_v5, %v165_v17  ;;  %v126_v22 = vsel %vm112_vm0, %v124_v18, 0.0  ;;  %v170_v23 = vsel %vm112_vm0, %v168_v19, 0.0  ;;  %v196_v5 = vld [vmem:[#allocation10] sm:$0xff] }
  0xd0   :  { %127 = vadd.xlane.f32.xlu0 %v126_v22 }
  0xd1   :  { %v125_v24 = vmul.f32 %v123_v20, %v123_v20  ;;  %v169_v25 = vmul.f32 %v881_v21, %v881_v21 }
  0xd3   :  { %v129_v26 = vsel %vm112_vm0, %v125_v24, 0.0  ;;  %v173_v27 = vsel %vm112_vm0, %v169_v25, 0.0 }
  0xd4   :  { %171 = vadd.xlane.f32.xlu0 %v170_v23  ;;  %130 = vadd.xlane.f32.xlu1 %v129_v26 }
  0xd8   :  { %174 = vadd.xlane.f32.xlu1 %v173_v27 }
 0x159   :  { %v128_v37 = vpop.xlane.xlu0 %127 }
 0x15a   :  { %v132_v38 = vmul.f32 0.03125, %v128_v37 }
 0x15c   :  { %v134_v39 = vadd.f32 1e-05, %v132_v38 }
 0x15d   :  { %v131_v40 = vpop.xlane.xlu1 %130  ;;  %v172_v41 = vpop.xlane.xlu0 %171 }
 0x15e   :  { %586 = vrsqrt.f32 %v134_v39  ;;  %v133_v42 = vmul.f32 0.03125, %v131_v40  ;;  %v176_v43 = vmul.f32 0.03125, %v172_v41 }
 0x160   :  { %v135_v44 = vadd.f32 1e-05, %v133_v42  ;;  %v178_v45 = vadd.f32 1e-05, %v176_v43 }
 0x161   :  { %v175_v46 = vpop.xlane.xlu1 %174 }
 0x162   :  { %588 = vrsqrt.f32 %v135_v44  ;;  %v177_v47 = vmul.f32 0.03125, %v175_v46 }
 0x163   :  { %590 = vrsqrt.f32 %v178_v45 }
 0x164   :  { %v179_v48 = vadd.f32 1e-05, %v177_v47 }
 0x166   :  { %592 = vrsqrt.f32 %v179_v48 }
 0x16b   :  { %v587_v49 = vpop.eup %586 }
 0x16c   :  { %v138_v51 = vmul.f32 %v587_v49, %v873_v12 }
 0x16e   :  { %v146_v53 = vmul.f32 %v514_v50, %v138_v51 }
 0x16f   :  { %v589_v54 = vpop.eup %588 }
 0x170   :  { %v591_v55 = vpop.eup %590  ;;  %v154_v56 = vadd.f32 %v515_v52, %v146_v53  ;;  %v139_v57 = vmul.f32 %v589_v54, %v123_v20 }
 0x171   :  { %v182_v58 = vmul.f32 %v591_v55, %v875_v13 }
 0x172   :  { %551 = vmatprep.mubr.msk.f32.mxu0 %vm112_vm0, %v154_v56  ;;  %v147_v59 = vmul.f32 %v514_v50, %v139_v57 }
 0x173   :  { %v593_v60 = vpop.eup %592  ;;  %v184_v61 = vmul.f32 %v514_v50, %v182_v58 }
 0x174   :  { %v155_v62 = vadd.f32 %v515_v52, %v147_v59  ;;  %v183_v63 = vmul.f32 %v593_v60, %v881_v21 }
 0x175   :  { %v186_v0 = vadd.f32 %v515_v52, %v184_v61 }
 0x176   :  { %552 = vmatmul.mubr.msk.f32.vlgmr.msra.gmra.mxu0 %vm112_vm0, %v155_v62  ;;  %v185_v2 = vmul.f32 %v514_v50, %v183_v63 }
 0x177   :  { %562 = vmatprep.mubr.msk.f32.mxu1 %vm112_vm0, %v186_v0  ;;  %566 = vmatpush3.msra.mxu0 %v199_v34 }
 0x178   :  { %567 = vmatprep.subr.mxu0 %v198_v1  ;;  %573 = vmatprep.mubr.msk.f32.mxu0 %vm112_vm0, %v186_v0  ;;  %v187_v4 = vadd.f32 %v515_v52, %v185_v2 }
 0x179   :  { %568 = vmatpush3.msra.mxu0 %v198_v1 }
 0x17a   :  { %569 = vmatprep.subr.mxu0 %v197_v3  ;;  %563 = vmatmul.mubr.msk.f32.vlgmr.msra.gmra.mxu1 %vm112_vm0, %v187_v4 }
 0x17b   :  { %570 = vmatpush3.msra.mxu0 %v197_v3 }
 0x17c   :  { %571 = vmatprep.subr.mxu0 %v196_v5 }
 0x17d   :  { %572 = vmatpush3.msra.mxu0 %v196_v5 }
 0x17e   :  { %574 = vmatmul.mubr.msk.f32.vlgmr.msra.gmra.mxu0 %vm112_vm0, %v187_v4 }
 0x236   :  { %v553_v7 = vpop.f32.mrf.mxu0 }
 0x237   :  { %v285_v8 = vadd.f32 %v553_v7, %v516_v6 }
 0x238   :  { %v279_v9 = vpop.f32.mrf.mxu0 }
 0x239   :  { %289 = vst.msk [vmem:[#allocation11 + $0x8] sm:$0xff] %vm112_vm0, %v285_v8  ;;  %v280_v11 = vadd.f32 %v516_v6, %v279_v9 }
 0x23a   :  { %v564_v12 = vpop.f32.mrf.mxu1 }
 0x23b   :  { %288 = vst.msk [vmem:[#allocation11] sm:$0xff] %vm112_vm0, %v280_v11  ;;  %v375_v13 = vadd.f32 %v564_v12, %v519_v10 }
 0x23c   :  { %v369_v15 = vpop.f32.mrf.mxu1 }
 0x23d   :  { %705 = shalt.err (!%p702_p1)
}
 0x23e   :  { %475 = dma.vmem_to_hbm [thread:$0]  %s470_s14, 256, %s947_s10, [#allocation4], %s766_s26, %s766_s26, %s767_s27   ;;  %379 = vst.msk [vmem:[#allocation12 + $0x8] sm:$0xff] %vm112_vm0, %v375_v13  ;;  %v370_v16 = vadd.f32 %v519_v10, %v369_v15  ;;  %v575_v17 = vpop.f32.mrf.mxu0 }
 0x23f   :  { %s773_s9 = smov [#allocation14]   ;;  %v459_v18 = vadd.f32 %v575_v17, %v522_v14  ;;  %s714_s21 = scalar_lea.vmem %s482_s18, 256 }
 0x240   :  { %s493_s5 = sshll.u32 %s773_s9, 4  ;;  %378 = vst.msk [vmem:[#allocation12] sm:$0xff] %vm112_vm0, %v370_v16  ;;  %v453_v19 = vpop.f32.mrf.mxu0  ;;  %p715_p2 = scmp.ne.s32.totalorder %s482_s18, %s714_s21  ;;  %s494_s5 = int_to_ptr.vmem [resolvable:$true] %s493_s5 }
 0x241   :  { %p719_p3 = scmp.lt.s32.totalorder %s482_s18, %s482_s18  ;;  %p720_p4 = scmp.lt.s32.totalorder %s714_s21, %s714_s21 }
 0x243   :  { %p721_p5 = por %p720_p4, %p719_p3 }
 0x245   :  { %p722_p6 = pnand %p721_p5, %p715_p2 }
 0x247   :  { %725 = shalt.err (!%p722_p6)
}
 0x248   :  { %487 = dma.vmem_to_hbm [thread:$0]  %s482_s18, 256, %s948_s11, [#allocation13], %s766_s26, %s766_s26, %s767_s27   ;;  %463 = vst.msk [vmem:[#allocation14 + $0x8] sm:$0xff] %vm112_vm0, %v459_v18  ;;  %v454_v20 = vadd.f32 %v522_v14, %v453_v19 }
 0x249   :  { %s734_s23 = scalar_lea.vmem %s494_s5, 256  ;;  %p739_p8 = scmp.lt.s32.totalorder %s494_s5, %s494_s5 }
 0x24a   :  { %462 = vst.msk [vmem:[#allocation14] sm:$0xff] %vm112_vm0, %v454_v20  ;;  %p735_p7 = scmp.ne.s32.totalorder %s494_s5, %s734_s23  ;;  %p740_p9 = scmp.lt.s32.totalorder %s734_s23, %s734_s23 }
 0x24c   :  { %p741_p10 = por %p740_p9, %p739_p8 }
 0x24e   :  { %p742_p11 = pnand %p741_p10, %p735_p7 }
 0x250   :  { %745 = shalt.err (!%p742_p11)
}
 0x251   :  { %499 = dma.vmem_to_hbm [thread:$0]  %s494_s5, 256, %s949_s12, [#allocation13], %s766_s26, %s766_s26, %s767_s27  }
 0x252   :  { %760 = dma.done.wait [#allocation4], 256  }
 0x253   :  { %761 = vsyncadd [#allocation4], 4294967040 }
 0x254   :  { %762 = dma.done.wait [#allocation13], 512  }
 0x255   :  { %763 = vsyncadd [#allocation13], 4294966784 }
 0x256   :  { %509 = vsyncpa [#allocation3], 1 }
 0x257   :  { %510 = vsyncpa [#allocation6], 1 }
 0x258   :  { %511 = vsyncpa [#allocation9], 1 }
 0x259   :  { %512 = vsyncpa [#allocation4], 1 }
 0x25a   :  { %513 = vsyncpa [#allocation13], 1 }

</bundles_post_ra>
